<compile_context>
chip_gen: v7x
topology: tpu7x:2x2x1
jax: 0.10.0
libtpu: 0.0.40
codegen_flags: <defaults>
</compile_context>

<pallas_src>
import functools

import jax
import jax.numpy as jnp
import numpy as np
from jax.experimental import pallas as pl
from jax.experimental.pallas import tpu as pltpu

_LANES = 128
_SUBLANES = 8
# (8, 32768) f32 block = 1 MiB per input ref, (3, 8, 32768) = 3 MiB output ref.
# Double-buffered: 2 * (3*1 + 3) MiB = 12 MiB VMEM.  vmem_limit_bytes = 32 MiB
# is within physical VMEM on v5e/v6e (128 MiB) and v7x (64 MiB).  Per review,
# 1 MiB tiles are already ~85% of HBM roofline on v6e; a single setting keeps
# the kernel safe on all three generations.
_MAX_BLOCK_LANES = 32 * 1024
_VMEM_LIMIT_BYTES = 32 * 1024 * 1024


def _ceil_div(a, b):
    return -(-a // b)


def _slab_geometry(num_elems):
    """Lane-dense slab geometry: 8 sublanes x W lanes, W a multiple of 128."""
    w = _ceil_div(max(num_elems, 1), _SUBLANES * _LANES) * _LANES
    bw = min(w, _MAX_BLOCK_LANES)
    w = _ceil_div(w, bw) * bw          # pad width so the grid divides evenly
    return w, bw


# ---------------------------------------------------------------------------
# Pallas kernel: fused pack of the three meta vectors into one [3, 8, W] slab.
# ---------------------------------------------------------------------------
def _pack_kernel(mu_ref, log_sigma_ref, log_v_ref, out_ref):
    # PlatipusNet.forward() performs no arithmetic, only re-layout; the kernel
    # stacks the three meta-parameter planes into one lane-dense slab in a
    # single streaming pass (unmasked, lane-dense vst on every row).
    out_ref[0] = mu_ref[...]
    out_ref[1] = log_sigma_ref[...]
    out_ref[2] = log_v_ref[...]


def platipus_pack(mu, log_sigma, log_v, *, block_lanes):
    """Pack three (8, W) meta-parameter planes into one (3, 8, W) slab."""
    s, w = mu.shape
    assert s == _SUBLANES
    assert w % block_lanes == 0 and block_lanes % _LANES == 0
    nb = w // block_lanes

    in_spec = pl.BlockSpec((s, block_lanes), lambda j: (0, j))
    out_spec = pl.BlockSpec((3, s, block_lanes), lambda j: (0, 0, j))
    slab_bytes = 3 * s * w * 4
    return pl.pallas_call(
        _pack_kernel,
        out_shape=jax.ShapeDtypeStruct((3, s, w), jnp.float32),
        grid=(nb,),
        in_specs=[in_spec, in_spec, in_spec],
        out_specs=out_spec,
        compiler_params=pltpu.CompilerParams(
            dimension_semantics=("parallel",),
            vmem_limit_bytes=_VMEM_LIMIT_BYTES,
        ),
        cost_estimate=pl.CostEstimate(
            flops=0, transcendentals=0, bytes_accessed=2 * slab_bytes),
    )(mu, log_sigma, log_v)


# ---------------------------------------------------------------------------
# Packing / unflattening glue (runs under jit together with the kernel).
# ---------------------------------------------------------------------------
def _pack_plane(vec, width):
    """Zero-pad a flat meta vector to 8*width and view it as (8, width)."""
    padded = _SUBLANES * width
    v = jnp.pad(vec.astype(jnp.float32), (0, padded - vec.shape[0]))
    return v.reshape(_SUBLANES, width)   # row-major reshape: layout-free view


def _vector_to_list(vec, parameter_shapes):
    """JAX equivalent of vector_to_list_parameters()."""
    out, off = [], 0
    for shape in parameter_shapes:
        size = int(np.prod(shape)) if len(shape) > 0 else 1
        out.append(vec[off:off + size].reshape(shape))
        off += size
    return out


def _platipus_forward(mu_vec, log_sigma_vec, log_v_vec, *,
                      parameter_shapes, num_base_params, width, block_lanes):
    slab = platipus_pack(
        _pack_plane(mu_vec, width),
        _pack_plane(log_sigma_vec, width),
        _pack_plane(log_v_vec, width),
        block_lanes=block_lanes)
    flat = slab.reshape(3, -1)[:, :num_base_params]
    return {
        "mu_theta": _vector_to_list(flat[0], parameter_shapes),
        "log_sigma_theta": _vector_to_list(flat[1], parameter_shapes),
        "log_v_q": _vector_to_list(flat[2], parameter_shapes),
    }


# ---------------------------------------------------------------------------
# PlatipusNet equivalent
# ---------------------------------------------------------------------------
class PlatipusNet:
    """JAX/Pallas port of the PyTorch PlatipusNet meta-parameter container."""

    def __init__(self, base_param_shapes, key):
        self.parameter_shapes = [tuple(s) for s in base_param_shapes]
        self.num_base_params = int(sum(
            int(np.prod(s)) if len(s) > 0 else 1 for s in self.parameter_shapes))

        n = self.num_base_params
        k_mu, k_sigma, k_vq = jax.random.split(key, 3)
        # Same init as the PyTorch module:
        #   mu_theta ~ N(0,1);  log_sigma_theta, log_v_q ~ N(0,1) - 4;  gammas = 0.01
        self.mu_theta = jax.random.normal(k_mu, (n,), dtype=jnp.float32)
        self.log_sigma_theta = jax.random.normal(k_sigma, (n,), dtype=jnp.float32) - 4.0
        self.log_v_q = jax.random.normal(k_vq, (n,), dtype=jnp.float32) - 4.0
        self.gamma_p = jnp.asarray(0.01, dtype=jnp.float32)
        self.gamma_q = jnp.asarray(0.01, dtype=jnp.float32)

        # Slab geometry is static -> hoisted out of forward(); whole tensor
        # path (pad -> Pallas pack kernel -> unpack) is jitted once here.
        width, block_lanes = _slab_geometry(n)
        self._run = jax.jit(functools.partial(
            _platipus_forward,
            parameter_shapes=self.parameter_shapes,
            num_base_params=n,
            width=width,
            block_lanes=block_lanes))

    def forward(self):
        meta_params = dict(
            self._run(self.mu_theta, self.log_sigma_theta, self.log_v_q))
        # TODO(synk): gamma_p / gamma_q are scalar passthroughs (no tensor work,
        # hence no Pallas equivalent); returned as-is like the PyTorch module.
        meta_params["gamma_p"] = self.gamma_p
        meta_params["gamma_q"] = self.gamma_q
        return meta_params


# ---------------------------------------------------------------------------
# Main
# ---------------------------------------------------------------------------
if __name__ == "__main__":
    # Small "base network" parameter shapes, exactly as a torch state_dict
    # would hold them:
    #   conv1.weight (4,3,3,3), conv1.bias (4,)
    #   conv2.weight (8,4,3,3), conv2.bias (8,)
    #   fc.weight   (10,128),   fc.bias   (10,)
    base_param_shapes = [
        (4, 3, 3, 3), (4,),
        (8, 4, 3, 3), (8,),
        (10, 128), (10,),
    ]

    key = jax.random.PRNGKey(0)
    net = PlatipusNet(base_param_shapes, key)

    meta_params = net.forward()
    meta_params = jax.block_until_ready(meta_params)

    # Reference check (pure JAX) against the Pallas-produced layout.
    for name, vec in (("mu_theta", net.mu_theta),
                      ("log_sigma_theta", net.log_sigma_theta),
                      ("log_v_q", net.log_v_q)):
        ref = _vector_to_list(vec, net.parameter_shapes)
        got = meta_params[name]
        assert len(got) == len(net.parameter_shapes)
        for g, r, s in zip(got, ref, net.parameter_shapes):
            assert g.shape == tuple(s), (name, g.shape, s)
            np.testing.assert_allclose(np.asarray(g), np.asarray(r),
                                       rtol=0.0, atol=0.0)
    np.testing.assert_allclose(float(meta_params["gamma_p"]), 0.01, rtol=1e-6)
    np.testing.assert_allclose(float(meta_params["gamma_q"]), 0.01, rtol=1e-6)

    print("KERNEL_OK")
</pallas_src>

<mosaic_0001>
module attributes {stable_mosaic.version = 11 : i64} {
  func.func @_pack_kernel(%arg0: i32, %arg1: memref<8x256xf32, #tpu.memory_space<vmem>>, %arg2: memref<8x256xf32, #tpu.memory_space<vmem>>, %arg3: memref<8x256xf32, #tpu.memory_space<vmem>>, %arg4: memref<3x8x256xf32, #tpu.memory_space<vmem>>) attributes {dimension_semantics = [#tpu.dimension_semantics<parallel>], iteration_bounds = array<i64: 1>, scalar_prefetch = 0 : i64, scratch_operands = 0 : i64, tpu.core_type = #tpu.core_type<tc>, window_params = [{transform_indices = @transform_0, window_bounds = array<i64: 8, 256>}, {transform_indices = @transform_1, window_bounds = array<i64: 8, 256>}, {transform_indices = @transform_2, window_bounds = array<i64: 8, 256>}, {transform_indices = @transform_3, window_bounds = array<i64: 3, 8, 256>}]} {
    %c0 = arith.constant 0 : index
    %c0_0 = arith.constant 0 : index
    %0 = vector.load %arg1[%c0, %c0_0] : memref<8x256xf32, #tpu.memory_space<vmem>>, vector<8x256xf32>
    %c0_1 = arith.constant 0 : index
    %c0_2 = arith.constant 0 : index
    %c0_3 = arith.constant 0 : index
    %1 = vector.load %arg4[%c0_1, %c0_2, %c0_3] : memref<3x8x256xf32, #tpu.memory_space<vmem>>, vector<1x8x256xf32>
    %2 = vector.shape_cast %1 : vector<1x8x256xf32> to vector<8x256xf32>
    %3 = vector.shape_cast %0 : vector<8x256xf32> to vector<1x8x256xf32>
    tpu.vector_store %arg4[%c0_1, %c0_2, %c0_3], %3 {strides = array<i32>} : memref<3x8x256xf32, #tpu.memory_space<vmem>>, vector<1x8x256xf32>,
    %c0_4 = arith.constant 0 : index
    %c0_5 = arith.constant 0 : index
    %4 = vector.load %arg2[%c0_4, %c0_5] : memref<8x256xf32, #tpu.memory_space<vmem>>, vector<8x256xf32>
    %c1 = arith.constant 1 : index
    %c0_6 = arith.constant 0 : index
    %c0_7 = arith.constant 0 : index
    %5 = vector.load %arg4[%c1, %c0_6, %c0_7] : memref<3x8x256xf32, #tpu.memory_space<vmem>>, vector<1x8x256xf32>
    %6 = vector.shape_cast %5 : vector<1x8x256xf32> to vector<8x256xf32>
    %7 = vector.shape_cast %4 : vector<8x256xf32> to vector<1x8x256xf32>
    tpu.vector_store %arg4[%c1, %c0_6, %c0_7], %7 {strides = array<i32>} : memref<3x8x256xf32, #tpu.memory_space<vmem>>, vector<1x8x256xf32>,
    %c0_8 = arith.constant 0 : index
    %c0_9 = arith.constant 0 : index
    %8 = vector.load %arg3[%c0_8, %c0_9] : memref<8x256xf32, #tpu.memory_space<vmem>>, vector<8x256xf32>
    %c2 = arith.constant 2 : index
    %c0_10 = arith.constant 0 : index
    %c0_11 = arith.constant 0 : index
    %9 = vector.load %arg4[%c2, %c0_10, %c0_11] : memref<3x8x256xf32, #tpu.memory_space<vmem>>, vector<1x8x256xf32>
    %10 = vector.shape_cast %9 : vector<1x8x256xf32> to vector<8x256xf32>
    %11 = vector.shape_cast %8 : vector<8x256xf32> to vector<1x8x256xf32>
    tpu.vector_store %arg4[%c2, %c0_10, %c0_11], %11 {strides = array<i32>} : memref<3x8x256xf32, #tpu.memory_space<vmem>>, vector<1x8x256xf32>,
    return
  }
  func.func @transform_0(%arg0: i32) -> (i32, i32) {
    %c0_i32 = arith.constant 0 : i32
    %c0_i32_0 = arith.constant 0 : i32
    return %c0_i32, %arg0 : i32, i32
  }
  func.func @transform_1(%arg0: i32) -> (i32, i32) {
    %c0_i32 = arith.constant 0 : i32
    %c0_i32_0 = arith.constant 0 : i32
    return %c0_i32, %arg0 : i32, i32
  }
  func.func @transform_2(%arg0: i32) -> (i32, i32) {
    %c0_i32 = arith.constant 0 : i32
    %c0_i32_0 = arith.constant 0 : i32
    return %c0_i32, %arg0 : i32, i32
  }
  func.func @transform_3(%arg0: i32) -> (i32, i32, i32) {
    %c0_i32 = arith.constant 0 : i32
    %c0_i32_0 = arith.constant 0 : i32
    %c0_i32_1 = arith.constant 0 : i32
    return %c0_i32, %c0_i32_0, %arg0 : i32, i32, i32
  }
}

</mosaic_0001>

<bundles_post_ra>
// kernel: _platipus_forward.1
= control target key start
LH: loop header
LB: loop body
LE: loop exit
PB: predicated region body
PF: predicated region fallthrough
CT: control target
= control target key end

     0   :  { %s92_s0 = inlined_call_operand.vmem [shape: f32[8,256], index: 0, kind: input, shape index: {}]   ;;  %s93_s3 = inlined_call_operand.vmem [shape: f32[3,8,256], index: 3, kind: output, shape index: {}]   ;;  %s94_s1 = inlined_call_operand.vmem [shape: f32[8,256], index: 1, kind: input, shape index: {}]   ;;  %s95_s2 = inlined_call_operand.vmem [shape: f32[8,256], index: 2, kind: input, shape index: {}]  }
   0x1   :  { %v14_v0 = vld [vmem:[%s92_s0] sm:$0xff]  ;;  %v15_v1 = vld [vmem:[%s92_s0 + $0x8] sm:$0xff] }
   0x2   :  { %v18_v2 = vld [vmem:[%s94_s1] sm:$0xff]  ;;  %16 = vst [vmem:[%s93_s3] sm:$0xff] %v14_v0  ;;  %17 = vst [vmem:[%s93_s3 + $0x8] sm:$0xff] %v15_v1  ;;  %v19_v3 = vld [vmem:[%s94_s1 + $0x8] sm:$0xff] }
   0x3   :  { %32 = vst [vmem:[%s93_s3 + $0x10] sm:$0xff] %v18_v2  ;;  %v23_v4 = vld [vmem:[%s95_s2] sm:$0xff]  ;;  %v24_v5 = vld [vmem:[%s95_s2 + $0x8] sm:$0xff]  ;;  %33 = vst [vmem:[%s93_s3 + $0x18] sm:$0xff] %v19_v3 }
   0x4   :  { %34 = vst [vmem:[%s93_s3 + $0x20] sm:$0xff] %v23_v4  ;;  %35 = vst [vmem:[%s93_s3 + $0x28] sm:$0xff] %v24_v5 }

</bundles_post_ra>
